<compile_context>
chip_gen: v7x
topology: tpu7x:2x2x1
jax: 0.10.0
libtpu: 0.0.40
codegen_flags: <defaults>
</compile_context>

<pallas_src>
import jax
import jax.numpy as jnp
from jax.experimental import pallas as pl
from jax.experimental.pallas import tpu as pltpu


def _pw_corr_adj_kernel(zT_ref, x_ref, w1_ref, b1_ref, w2_ref, b2_ref,
                        wadj_ref, badj_ref, o_ref, slab_ref):
    """zT_ref: (Bt, K, Cp)  x_ref: (Bt, Cp, Lx)  o_ref: (adj, Bt*Lx)
       slab_ref: VMEM scratch (K, Bt*Lx) f32."""
    f32 = jnp.float32
    mx = jnp.bfloat16          # MXU operand dtype for the two big matmuls

    Bt, K, _ = zT_ref.shape
    Lx = x_ref.shape[-1]
    BtLx = Bt * Lx

    # (1) Pixel-wise correlation: one batched MXU call, bf16 operands, f32 acc.
    corr = jnp.einsum("bkc,bcl->bkl",
                      zT_ref[...].astype(mx), x_ref[...].astype(mx),
                      preferred_element_type=f32)               # (Bt, K, Lx) f32

    # (2) Lane-dense slab (K, Bt*Lx): per-batch stores into the VMEM scratch
    #     (stores only -- no per-batch matmuls, no live concatenate partials).
    for b in range(Bt):        # Bt is small & static by construction
        slab_ref[:, b * Lx:(b + 1) * Lx] = corr[b]
    slab = slab_ref[...]                                        # (K, BtLx) f32

    # (3) SE channel attention gate, all gate math in f32.
    #     Spatial mean on the MXU: slab @ block-mean matrix -> (K, Bt).
    j = jax.lax.broadcasted_iota(jnp.int32, (BtLx, Bt), 0)
    b_idx = jax.lax.broadcasted_iota(jnp.int32, (BtLx, Bt), 1)
    mean_mat = ((j >= b_idx * Lx) &
                (j < (b_idx + 1) * Lx)).astype(f32) * (1.0 / Lx)  # (BtLx, Bt)
    avgT = jnp.dot(slab, mean_mat, preferred_element_type=f32)    # (K, Bt)

    # 2-layer MLP in transposed orientation (original conv weight orientation).
    hT = jnp.maximum(
        jnp.dot(w1_ref[...], avgT, preferred_element_type=f32) + b1_ref[...],
        0.0)                                                      # (K, Bt)
    gateT = jax.nn.sigmoid(
        jnp.dot(w2_ref[...], hT, preferred_element_type=f32) + b2_ref[...])  # (K, Bt)

    # Broadcast the per-batch gate over its lane block with a tiny MXU matmul
    # (avoids a lanes->sublanes relayout of the gate vector); apply in f32.
    bb = jax.lax.broadcasted_iota(jnp.int32, (Bt, BtLx), 0)
    jj = jax.lax.broadcasted_iota(jnp.int32, (Bt, BtLx), 1)
    sel = ((jj >= bb * Lx) & (jj < (bb + 1) * Lx)).astype(f32)    # (Bt, BtLx)
    gate_map = jnp.dot(gateT, sel, preferred_element_type=f32)    # (K, BtLx)
    gated = slab * gate_map                                       # dense f32 VPU

    # (4) Adjust conv (1x1): ONE lane-dense MXU matmul + f32 bias, unmasked vst.
    out = jnp.dot(wadj_ref[...].astype(mx), gated.astype(mx),
                  preferred_element_type=f32) + badj_ref[...]     # (adj, BtLx)
    o_ref[...] = out.astype(o_ref.dtype)


def pw_corr_adj(z_nchw, x_nchw, params, *, batch_tile=None, core_parallel=False,
                out_dtype=None):
    """z_nchw: (B, C, Hz, Wz) template, x_nchw: (B, C, Hx, Wx) search.
    Returns (B, adj_channel, Hx, Wx) in `out_dtype` (defaults to x dtype)."""
    B, C, Hz, Wz = z_nchw.shape
    Bx, Cx, Hx, Wx = x_nchw.shape
    assert Bx == B and Cx == C
    K = Hz * Wz                        # num_kernel
    Lx = Hx * Wx
    adj = params["w_adj"].shape[0]
    out_dtype = x_nchw.dtype if out_dtype is None else out_dtype

    # Batch-tile selection: smallest divisor of B with Bt*Lx >= 128 lanes
    # (lane-dense output slab / full MXU lane width) while keeping as many
    # grid steps as possible so the DMA pipeline stays busy.
    if batch_tile is None:
        target = max(1, -(-128 // Lx))                 # ceil(128 / Lx)
        divs = [d for d in range(1, B + 1) if B % d == 0]
        cands = [d for d in divs if d >= target]
        Bt = min(cands) if cands else B
    else:
        Bt = batch_tile
    assert B % Bt == 0, "batch_tile must divide batch"
    n_tiles = B // Bt

    # Operand layouts: z -> (B, K, C) so the kernel contracts channels with no
    # in-kernel transpose; C zero-padded to a sublane multiple (exact: padded
    # channels are zero in both operands).  Real LightTrack C is already /8.
    Cp = ((C + 7) // 8) * 8
    zt = z_nchw.reshape(B, C, K).transpose(0, 2, 1)    # (B, K, C)
    xf = x_nchw.reshape(B, C, Lx)                      # (B, C, Lx)
    if Cp != C:
        zt = jnp.pad(zt, ((0, 0), (0, 0), (0, Cp - C)))
        xf = jnp.pad(xf, ((0, 0), (0, Cp - C), (0, 0)))

    f32 = jnp.float32
    w1 = params["w1"].astype(f32)                      # (K, K) conv orientation
    b1 = params["b1"].reshape(K, 1).astype(f32)
    w2 = params["w2"].astype(f32)                      # (K, K)
    b2 = params["b2"].reshape(K, 1).astype(f32)
    wadj = params["w_adj"].astype(f32)                 # (adj, K)
    badj = params["b_adj"].reshape(adj, 1).astype(f32)

    const = lambda i: (0, 0)   # resident weight blocks (constant index map)
    # TODO(synk): mark the six constant weight specs pipeline_mode=pl.Buffered(1)
    # once single-buffered constant operands are confirmed on the target build.

    # Explicit VMEM budget (v7x: 64 MiB physical / 32 MiB scoped default).
    osize = jnp.dtype(out_dtype).itemsize
    est = (2 * (Bt * K * Cp + Bt * Cp * Lx) * 4            # double-buffered inputs
           + 2 * adj * Bt * Lx * osize                     # double-buffered output
           + 2 * (2 * K * K + 2 * K + adj * K + adj) * 4   # resident weights
           + K * Bt * Lx * 4)                              # slab scratch
    vmem_limit = int(min(max(2 * est + (4 << 20), 16 << 20), 48 << 20))

    # Engage the second TensorCore (v7x) only when there are >= 2 batch tiles;
    # on v5e/v6e (single TC) plain "parallel" is near-neutral.
    if core_parallel and n_tiles >= 2:
        sem = (pltpu.CORE_PARALLEL,)
    else:
        sem = ("parallel",)

    out = pl.pallas_call(
        _pw_corr_adj_kernel,
        out_shape=jax.ShapeDtypeStruct((adj, B * Lx), out_dtype),
        grid_spec=pltpu.PrefetchScalarGridSpec(
            num_scalar_prefetch=0,
            grid=(n_tiles,),
            in_specs=[
                pl.BlockSpec((Bt, K, Cp), lambda i: (i, 0, 0)),
                pl.BlockSpec((Bt, Cp, Lx), lambda i: (i, 0, 0)),
                pl.BlockSpec((K, K), const),
                pl.BlockSpec((K, 1), const),
                pl.BlockSpec((K, K), const),
                pl.BlockSpec((K, 1), const),
                pl.BlockSpec((adj, K), const),
                pl.BlockSpec((adj, 1), const),
            ],
            out_specs=pl.BlockSpec((adj, Bt * Lx), lambda i: (0, i)),
            scratch_shapes=[pltpu.VMEM((K, Bt * Lx), jnp.float32)],
        ),
        compiler_params=pltpu.CompilerParams(
            dimension_semantics=sem, vmem_limit_bytes=vmem_limit),
    )(zt, xf, w1, b1, w2, b2, wadj, badj)

    # (adj, B*Lx) lane-dense kernel layout -> (B, adj, Hx, Wx) NCHW.
    out = out.reshape(adj, B, Lx).transpose(1, 0, 2)
    return out.reshape(B, adj, Hx, Wx)


def init_params(key, num_kernel, adj_channel, dtype=jnp.float32):
    """Synthetic weights matching the module's shapes:
       CAModule.fc1: Conv2d(K, K, 1), CAModule.fc2: Conv2d(K, K, 1),
       adj_layer:    Conv2d(K, adj_channel, 1)."""
    k1, k2, k3, k4, k5, k6 = jax.random.split(key, 6)
    K = num_kernel
    return {
        "w1": jax.random.normal(k1, (K, K), dtype) * 0.05,
        "b1": jax.random.normal(k2, (K,), dtype) * 0.05,
        "w2": jax.random.normal(k3, (K, K), dtype) * 0.05,
        "b2": jax.random.normal(k4, (K,), dtype) * 0.05,
        "w_adj": jax.random.normal(k5, (adj_channel, K), dtype) * 0.05,
        "b_adj": jax.random.normal(k6, (adj_channel,), dtype) * 0.05,
    }


if __name__ == "__main__":
    key = jax.random.PRNGKey(0)
    kz, kx, kp = jax.random.split(key, 3)

    # Small shapes consistent with the module: template 4x4 -> num_kernel = 16.
    # B=8 so the default batch tile (Bt=2 -> 128-lane output slab) gives a
    # 4-step grid and exercises the DMA/compute pipeline.
    B, C = 8, 4
    Hz, Wz = 4, 4
    Hx, Wx = 8, 8
    num_kernel = Hz * Wz          # 16
    adj_channel = 32

    z = jax.random.normal(kz, (B, C, Hz, Wz), jnp.float32)   # template / kernel
    x = jax.random.normal(kx, (B, C, Hx, Wx), jnp.float32)   # search region
    params = init_params(kp, num_kernel, adj_channel)

    out = pw_corr_adj(z, x, params)
    jax.block_until_ready(out)
    assert out.shape == (B, adj_channel, Hx, Wx), out.shape

    # Pure-JAX f32 reference of the original module math.
    z_m = z.reshape(B, C, -1)
    x_m = x.reshape(B, C, -1)
    corr = jnp.einsum("bck,bcl->bkl", z_m, x_m)                      # (B, K, Lx)
    avg = corr.mean(axis=-1)                                         # (B, K)
    h = jnp.maximum(avg @ params["w1"].T + params["b1"], 0.0)
    g = jax.nn.sigmoid(h @ params["w2"].T + params["b2"])            # (B, K)
    att = corr * g[:, :, None]
    ref = jnp.einsum("ok,bkl->bol", params["w_adj"], att) + params["b_adj"][None, :, None]
    ref = ref.reshape(B, adj_channel, Hx, Wx)

    # The two big matmuls use bf16 MXU operands (f32 accumulation); the gate is
    # computed and applied in f32 -> compare with a correspondingly loosened
    # tolerance.
    err = float(jnp.abs(out - ref).max())
    assert jnp.allclose(out, ref, atol=2e-2, rtol=2e-2), err

    print("KERNEL_OK")
</pallas_src>

<mosaic_0001>
module attributes {stable_mosaic.version = 11 : i64} {
  func.func @_pw_corr_adj_kernel(%arg0: i32, %arg1: memref<2x16x8xf32, #tpu.memory_space<vmem>>, %arg2: memref<2x8x64xf32, #tpu.memory_space<vmem>>, %arg3: memref<16x16xf32, #tpu.memory_space<vmem>>, %arg4: memref<16x1xf32, #tpu.memory_space<vmem>>, %arg5: memref<16x16xf32, #tpu.memory_space<vmem>>, %arg6: memref<16x1xf32, #tpu.memory_space<vmem>>, %arg7: memref<32x16xf32, #tpu.memory_space<vmem>>, %arg8: memref<32x1xf32, #tpu.memory_space<vmem>>, %arg9: memref<32x128xf32, #tpu.memory_space<vmem>>, %arg10: memref<16x128xf32, #tpu.memory_space<vmem>>) attributes {dimension_semantics = [#tpu.dimension_semantics<parallel>], iteration_bounds = array<i64: 4>, scalar_prefetch = 0 : i64, scratch_operands = 1 : i64, tpu.core_type = #tpu.core_type<tc>, window_params = [{transform_indices = @transform_0, window_bounds = array<i64: 2, 16, 8>}, {transform_indices = @transform_1, window_bounds = array<i64: 2, 8, 64>}, {pipeline_mode = #tpu.pipeline_mode<synchronous>, transform_indices = @transform_2, window_bounds = array<i64: 16, 16>}, {pipeline_mode = #tpu.pipeline_mode<synchronous>, transform_indices = @transform_3, window_bounds = array<i64: 16, 1>}, {pipeline_mode = #tpu.pipeline_mode<synchronous>, transform_indices = @transform_4, window_bounds = array<i64: 16, 16>}, {pipeline_mode = #tpu.pipeline_mode<synchronous>, transform_indices = @transform_5, window_bounds = array<i64: 16, 1>}, {pipeline_mode = #tpu.pipeline_mode<synchronous>, transform_indices = @transform_6, window_bounds = array<i64: 32, 16>}, {pipeline_mode = #tpu.pipeline_mode<synchronous>, transform_indices = @transform_7, window_bounds = array<i64: 32, 1>}, {transform_indices = @transform_8, window_bounds = array<i64: 32, 128>}]} {
    %c0 = arith.constant 0 : index
    %c0_0 = arith.constant 0 : index
    %c0_1 = arith.constant 0 : index
    %0 = vector.load %arg1[%c0, %c0_0, %c0_1] : memref<2x16x8xf32, #tpu.memory_space<vmem>>, vector<2x16x8xf32>
    %1 = arith.truncf %0 : vector<2x16x8xf32> to vector<2x16x8xbf16>
    %c0_2 = arith.constant 0 : index
    %c0_3 = arith.constant 0 : index
    %c0_4 = arith.constant 0 : index
    %2 = vector.load %arg2[%c0_2, %c0_3, %c0_4] : memref<2x8x64xf32, #tpu.memory_space<vmem>>, vector<2x8x64xf32>
    %3 = arith.truncf %2 : vector<2x8x64xf32> to vector<2x8x64xbf16>
    "tpu.trace_start"() <{level = 10 : i32, message = "bkc,bcl->bkl"}> : () -> ()
    %cst = arith.constant dense<0.000000e+00> : vector<2x16x64xf32>
    %4 = tpu.matmul %1, %3, %cst {dimension_numbers = #tpu.dot_dimension_numbers<[2], [1], [1], [2], [0, 0, 0, 1, 1, 2], [0], [0]>} : vector<2x16x8xbf16>, vector<2x8x64xbf16>, vector<2x16x64xf32> -> vector<2x16x64xf32>
    "tpu.trace_stop"() : () -> ()
    %5 = vector.extract_strided_slice %4 {offsets = [0, 0, 0], sizes = [1, 16, 64], strides = [1, 1, 1]} : vector<2x16x64xf32> to vector<1x16x64xf32>
    %6 = vector.shape_cast %5 : vector<1x16x64xf32> to vector<16x64xf32>
    %c0_5 = arith.constant 0 : index
    %c0_6 = arith.constant 0 : index
    %7 = vector.load %arg10[%c0_5, %c0_6] : memref<16x128xf32, #tpu.memory_space<vmem>>, vector<16x64xf32>
    tpu.vector_store %arg10[%c0_5, %c0_6], %6 {strides = array<i32>} : memref<16x128xf32, #tpu.memory_space<vmem>>, vector<16x64xf32>,
    %8 = vector.extract_strided_slice %4 {offsets = [1, 0, 0], sizes = [1, 16, 64], strides = [1, 1, 1]} : vector<2x16x64xf32> to vector<1x16x64xf32>
    %9 = vector.shape_cast %8 : vector<1x16x64xf32> to vector<16x64xf32>
    %c0_7 = arith.constant 0 : index
    %c64 = arith.constant 64 : index
    %10 = vector.load %arg10[%c0_7, %c64] : memref<16x128xf32, #tpu.memory_space<vmem>>, vector<16x64xf32>
    tpu.vector_store %arg10[%c0_7, %c64], %9 {strides = array<i32>} : memref<16x128xf32, #tpu.memory_space<vmem>>, vector<16x64xf32>,
    %c0_8 = arith.constant 0 : index
    %c0_9 = arith.constant 0 : index
    %11 = vector.load %arg10[%c0_8, %c0_9] : memref<16x128xf32, #tpu.memory_space<vmem>>, vector<16x128xf32>
    %12 = tpu.iota {dimensions = array<i32: 0>} : vector<128x2xi32>
    %13 = tpu.iota {dimensions = array<i32: 1>} : vector<128x2xi32>
    %c64_i32 = arith.constant 64 : i32
    %14 = vector.broadcast %c64_i32 : i32 to vector<128x2xi32>
    %15 = arith.muli %13, %14 : vector<128x2xi32>
    %16 = arith.cmpi sge, %12, %15 : vector<128x2xi32>
    %c1_i32 = arith.constant 1 : i32
    %17 = vector.broadcast %c1_i32 : i32 to vector<128x2xi32>
    %18 = arith.addi %13, %17 : vector<128x2xi32>
    %c64_i32_10 = arith.constant 64 : i32
    %19 = vector.broadcast %c64_i32_10 : i32 to vector<128x2xi32>
    %20 = arith.muli %18, %19 : vector<128x2xi32>
    %21 = arith.cmpi slt, %12, %20 : vector<128x2xi32>
    %22 = arith.andi %16, %21 : vector<128x2xi1>
    %23 = arith.extui %22 : vector<128x2xi1> to vector<128x2xi32>
    %24 = arith.sitofp %23 : vector<128x2xi32> to vector<128x2xf32>
    %cst_11 = arith.constant 1.562500e-02 : f32
    %25 = vector.broadcast %cst_11 : f32 to vector<128x2xf32>
    %26 = arith.mulf %24, %25 : vector<128x2xf32>
    %cst_12 = arith.constant dense<0.000000e+00> : vector<16x2xf32>
    %27 = tpu.matmul %11, %26, %cst_12 {dimension_numbers = #tpu.dot_dimension_numbers<[1], [0], [0], [1], [0, 0, 1, 1], [], []>} : vector<16x128xf32>, vector<128x2xf32>, vector<16x2xf32> -> vector<16x2xf32>
    %c0_13 = arith.constant 0 : index
    %c0_14 = arith.constant 0 : index
    %28 = vector.load %arg3[%c0_13, %c0_14] : memref<16x16xf32, #tpu.memory_space<vmem>>, vector<16x16xf32>
    %cst_15 = arith.constant dense<0.000000e+00> : vector<16x2xf32>
    %29 = tpu.matmul %28, %27, %cst_15 {dimension_numbers = #tpu.dot_dimension_numbers<[1], [0], [0], [1], [0, 0, 1, 1], [], []>} : vector<16x16xf32>, vector<16x2xf32>, vector<16x2xf32> -> vector<16x2xf32>
    %c0_16 = arith.constant 0 : index
    %c0_17 = arith.constant 0 : index
    %30 = vector.load %arg4[%c0_16, %c0_17] : memref<16x1xf32, #tpu.memory_space<vmem>>, vector<16x1xf32>
    %31 = vector.broadcast %30 : vector<16x1xf32> to vector<16x2xf32>
    %32 = arith.addf %29, %31 : vector<16x2xf32>
    %cst_18 = arith.constant 0.000000e+00 : f32
    %33 = vector.broadcast %cst_18 : f32 to vector<16x2xf32>
    %34 = arith.maximumf %32, %33 : vector<16x2xf32>
    %c0_19 = arith.constant 0 : index
    %c0_20 = arith.constant 0 : index
    %35 = vector.load %arg5[%c0_19, %c0_20] : memref<16x16xf32, #tpu.memory_space<vmem>>, vector<16x16xf32>
    %cst_21 = arith.constant dense<0.000000e+00> : vector<16x2xf32>
    %36 = tpu.matmul %35, %34, %cst_21 {dimension_numbers = #tpu.dot_dimension_numbers<[1], [0], [0], [1], [0, 0, 1, 1], [], []>} : vector<16x16xf32>, vector<16x2xf32>, vector<16x2xf32> -> vector<16x2xf32>
    %c0_22 = arith.constant 0 : index
    %c0_23 = arith.constant 0 : index
    %37 = vector.load %arg6[%c0_22, %c0_23] : memref<16x1xf32, #tpu.memory_space<vmem>>, vector<16x1xf32>
    %38 = vector.broadcast %37 : vector<16x1xf32> to vector<16x2xf32>
    %39 = arith.addf %36, %38 : vector<16x2xf32>
    %40 = arith.negf %39 : vector<16x2xf32>
    %41 = math.exp %40 : vector<16x2xf32>
    %cst_24 = arith.constant 1.000000e+00 : f32
    %42 = vector.broadcast %cst_24 : f32 to vector<16x2xf32>
    %43 = arith.addf %42, %41 : vector<16x2xf32>
    %44 = arith.divf %42, %43 : vector<16x2xf32>
    %45 = tpu.iota {dimensions = array<i32: 0>} : vector<2x128xi32>
    %46 = tpu.iota {dimensions = array<i32: 1>} : vector<2x128xi32>
    %c64_i32_25 = arith.constant 64 : i32
    %47 = vector.broadcast %c64_i32_25 : i32 to vector<2x128xi32>
    %48 = arith.muli %45, %47 : vector<2x128xi32>
    %49 = arith.cmpi sge, %46, %48 : vector<2x128xi32>
    %c1_i32_26 = arith.constant 1 : i32
    %50 = vector.broadcast %c1_i32_26 : i32 to vector<2x128xi32>
    %51 = arith.addi %45, %50 : vector<2x128xi32>
    %c64_i32_27 = arith.constant 64 : i32
    %52 = vector.broadcast %c64_i32_27 : i32 to vector<2x128xi32>
    %53 = arith.muli %51, %52 : vector<2x128xi32>
    %54 = arith.cmpi slt, %46, %53 : vector<2x128xi32>
    %55 = arith.andi %49, %54 : vector<2x128xi1>
    %56 = arith.extui %55 : vector<2x128xi1> to vector<2x128xi32>
    %57 = arith.sitofp %56 : vector<2x128xi32> to vector<2x128xf32>
    %cst_28 = arith.constant dense<0.000000e+00> : vector<16x128xf32>
    %58 = tpu.matmul %44, %57, %cst_28 {dimension_numbers = #tpu.dot_dimension_numbers<[1], [0], [0], [1], [0, 0, 1, 1], [], []>} : vector<16x2xf32>, vector<2x128xf32>, vector<16x128xf32> -> vector<16x128xf32>
    %59 = arith.mulf %11, %58 : vector<16x128xf32>
    %c0_29 = arith.constant 0 : index
    %c0_30 = arith.constant 0 : index
    %60 = vector.load %arg7[%c0_29, %c0_30] : memref<32x16xf32, #tpu.memory_space<vmem>>, vector<32x16xf32>
    %61 = arith.truncf %60 : vector<32x16xf32> to vector<32x16xbf16>
    %62 = arith.truncf %59 : vector<16x128xf32> to vector<16x128xbf16>
    %cst_31 = arith.constant dense<0.000000e+00> : vector<32x128xf32>
    %63 = tpu.matmul %61, %62, %cst_31 {dimension_numbers = #tpu.dot_dimension_numbers<[1], [0], [0], [1], [0, 0, 1, 1], [], []>} : vector<32x16xbf16>, vector<16x128xbf16>, vector<32x128xf32> -> vector<32x128xf32>
    %c0_32 = arith.constant 0 : index
    %c0_33 = arith.constant 0 : index
    %64 = vector.load %arg8[%c0_32, %c0_33] : memref<32x1xf32, #tpu.memory_space<vmem>>, vector<32x1xf32>
    %65 = vector.broadcast %64 : vector<32x1xf32> to vector<32x128xf32>
    %66 = arith.addf %63, %65 : vector<32x128xf32>
    %c0_34 = arith.constant 0 : index
    %c0_35 = arith.constant 0 : index
    %67 = vector.load %arg9[%c0_34, %c0_35] : memref<32x128xf32, #tpu.memory_space<vmem>>, vector<32x128xf32>
    tpu.vector_store %arg9[%c0_34, %c0_35], %66 {strides = array<i32>} : memref<32x128xf32, #tpu.memory_space<vmem>>, vector<32x128xf32>,
    return
  }
  func.func @transform_0(%arg0: i32) -> (i32, i32, i32) {
    %c0_i32 = arith.constant 0 : i32
    %c0_i32_0 = arith.constant 0 : i32
    %c0_i32_1 = arith.constant 0 : i32
    return %arg0, %c0_i32, %c0_i32_0 : i32, i32, i32
  }
  func.func @transform_1(%arg0: i32) -> (i32, i32, i32) {
    %c0_i32 = arith.constant 0 : i32
    %c0_i32_0 = arith.constant 0 : i32
    %c0_i32_1 = arith.constant 0 : i32
    return %arg0, %c0_i32, %c0_i32_0 : i32, i32, i32
  }
  func.func @transform_2(%arg0: i32) -> (i32, i32) {
    %c0_i32 = arith.constant 0 : i32
    %c0_i32_0 = arith.constant 0 : i32
    %c0_i32_1 = arith.constant 0 : i32
    return %c0_i32, %c0_i32_0 : i32, i32
  }
  func.func @transform_3(%arg0: i32) -> (i32, i32) {
    %c0_i32 = arith.constant 0 : i32
    %c0_i32_0 = arith.constant 0 : i32
    %c0_i32_1 = arith.constant 0 : i32
    return %c0_i32, %c0_i32_0 : i32, i32
  }
  func.func @transform_4(%arg0: i32) -> (i32, i32) {
    %c0_i32 = arith.constant 0 : i32
    %c0_i32_0 = arith.constant 0 : i32
    %c0_i32_1 = arith.constant 0 : i32
    return %c0_i32, %c0_i32_0 : i32, i32
  }
  func.func @transform_5(%arg0: i32) -> (i32, i32) {
    %c0_i32 = arith.constant 0 : i32
    %c0_i32_0 = arith.constant 0 : i32
    %c0_i32_1 = arith.constant 0 : i32
    return %c0_i32, %c0_i32_0 : i32, i32
  }
  func.func @transform_6(%arg0: i32) -> (i32, i32) {
    %c0_i32 = arith.constant 0 : i32
    %c0_i32_0 = arith.constant 0 : i32
    %c0_i32_1 = arith.constant 0 : i32
    return %c0_i32, %c0_i32_0 : i32, i32
  }
  func.func @transform_7(%arg0: i32) -> (i32, i32) {
    %c0_i32 = arith.constant 0 : i32
    %c0_i32_0 = arith.constant 0 : i32
    %c0_i32_1 = arith.constant 0 : i32
    return %c0_i32, %c0_i32_0 : i32, i32
  }
  func.func @transform_8(%arg0: i32) -> (i32, i32) {
    %c0_i32 = arith.constant 0 : i32
    %c0_i32_0 = arith.constant 0 : i32
    return %c0_i32, %arg0 : i32, i32
  }
}

</mosaic_0001>

<bundles_post_ra>
// kernel: tpu_custom_call.1
= control target key start
LH: loop header
LB: loop body
LE: loop exit
PB: predicated region body
PF: predicated region fallthrough
CT: control target
= control target key end

     0   :  { %13 = vsyncpa [#allocation4], 0  ;;  %s1762_s0 = inlined_call_operand.vmem [shape: f32[8,16,8], index: 0, kind: input, shape index: {}]   ;;  %s1763_s1 = inlined_call_operand.vmem [shape: f32[8,8,64], index: 1, kind: input, shape index: {}]   ;;  %s1764_s2 = inlined_call_operand.vmem [shape: f32[16,16], index: 2, kind: input, shape index: {}]   ;;  %s1765_s3 = inlined_call_operand.vmem [shape: f32[16,1], index: 3, kind: input, shape index: {}]   ;;  %s1766_s4 = inlined_call_operand.vmem [shape: f32[16,16], index: 4, kind: input, shape index: {}]   ;;  %s1767_s5 = inlined_call_operand.vmem [shape: f32[16,1], index: 5, kind: input, shape index: {}]   ;;  %s1768_s6 = inlined_call_operand.vmem [shape: f32[32,16], index: 6, kind: input, shape index: {}]   ;;  %s1769_s7 = inlined_call_operand.vmem [shape: f32[32,1], index: 7, kind: input, shape index: {}]   ;;  %s1770_s8 = inlined_call_operand.hbm [shape: f32[32,512], index: 8, kind: output, shape index: {}]  }
   0x1   :  { %15 = vsyncpa [#allocation4 + $0x1], 0  ;;  %s1491_s27 = smov 0   ;;  %s1493_s28 = smov 0  }
   0x2   :  { %s1495_s29 = smov 0   ;;  %s1497_s30 = smov 0  }
   0x3 LB: > { %s1512_s9 = sadd.s32 4294967295, %s1436_s30   ;;  %s1125_s10 = sadd.s32 4294967294, %s1436_s30   ;;  %s1436_s30 = sphi %s1497_s30, %s1776_s30   ;;  %s1432_s29 = sphi %s1495_s29, %s1775_s29   ;;  %s1428_s28 = sphi %s1493_s28, %s1774_s28   ;;  %s1424_s27 = sphi %s1491_s27, %s1773_s27  }
   0x4   : > { %s1516_s11 = sadd.s32 1, %s1436_s30   ;;  %s206_s12 = sadd.s32 1, %s1432_s29 }
   0x5   : > { %s203_s13 = ssub.s32 %s1436_s30, %s1516_s11  ;;  %p216_p0 = scmp.ne.s32.totalorder %s1432_s29, %s1428_s28 }
   0x6   : > { %p204_p1 = scmp.eq.s32.totalorder %s203_s13, 0  ;;  %p217_p2 = scmp.eq.s32.totalorder %s1512_s9, 3 }
   0x7   : > { %p222_p3 = scmp.ne.s32.totalorder %s1428_s28, %s1424_s27  ;;  %p223_p4 = scmp.eq.s32.totalorder %s1125_s10, 3 }
   0x8   : > { %s1527_s14 = scalar_select %p204_p1, %s1432_s29, %s206_s12  }
   0x9   : > { %p1529_p5 = por %p217_p2, %p216_p0  ;;  %p1533_p6 = por %p223_p4, %p222_p3 }
   0xa   : > { %p1128_p7 = scmp.ge.s32.totalorder %s1436_s30, 1  ;;  %p278_p8 = scmp.lt.s32.totalorder %s1436_s30, 5 }
   0xc   : > { %p279_p9 = pnand %p1128_p7, %p278_p8 }
   0xd   : > { %s1130_s17 = sshll.u32 (!%p279_p9), %s1512_s9, 1  ;;  %v1438_v0 = vmov (!%p279_p9), 0.0   ;;  %vm1439_vm0 = vmmov (!%p279_p9), 0   ;;  %vm346_vm1 = vcmask (!%p279_p9), 1043456   ;;  %vm342_vm2 = vcmask (!%p279_p9), 64512   ;;  %s1440_s26 = smov (!%p279_p9), 64  }
   0xe   : > { %282 = sbr.rel (%p279_p9) target bundleno = 1508 (0x5e4), region = 52  ;;  %1212 = vmatprep.subr.bf16.mxu1 (!%p279_p9), %v1438_v0  ;;  %p319_p10 = scmp.lt.s32.totalorder (!%p279_p9), %s1130_s17, 7  ;;  %1214 = vmatprep.mubr.msk.bf16.mxu1 (!%p279_p9), %vm1439_vm0, %v1438_v0  ;;  %v454_v13 = vlaneseq (!%p279_p9) }
   0xf   : > { %1206 = vmatprep.subr.bf16.mxu0 (!%p279_p9), %v1438_v0  ;;  %1208 = vmatprep.mubr.msk.bf16.mxu0 (!%p279_p9), %vm1439_vm0, %v1438_v0  ;;  %s315_s20 = sand.u32 (!%p279_p9), 1, %s1428_s28   ;;  %s1166_s24 = sshll.u32 (!%p279_p9), %s1512_s9, 7 }
  0x10   : > { %v1550_v14 = vshrl.u32 (!%p279_p9), %v454_v13, 7  ;;  %v1552_v15 = vand.u32 (!%p279_p9), 127, %v454_v13  ;;  %s1129_s21 = sshll.u32 (!%p279_p9), %s315_s20, 5  ;;  %s1719_s10 = scalar_lea.hbm (!%p279_p9), %s1770_s8, %s1166_s24 }
  0x11   : > { %s1721_s9 = scalar_lea.sflag (!%p279_p9), [#allocation4], %s315_s20  ;;  %s1442_s13 = smov (!%p279_p9), [#allocation3]  }
  0x12   : > { %v456_v16 = vadd.s32 (!%p279_p9), 8, %v1550_v14  ;;  %v1556_v17 = vmul.u32 (!%p279_p9), 64, %v1552_v15  ;;  %v490_v18 = vadd.s32 (!%p279_p9), 1, %v1552_v15  ;;  %v457_v19 = vadd.s32 (!%p279_p9), 16, %v1550_v14 }
  0x13   : > { %v458_v20 = vadd.s32 (!%p279_p9), 24, %v1550_v14  ;;  %v459_v21 = vadd.s32 (!%p279_p9), 32, %v1550_v14  ;;  %v460_v22 = vadd.s32 (!%p279_p9), 40, %v1550_v14  ;;  %v461_v24 = vadd.s32 (!%p279_p9), 48, %v1550_v14 }
  0x14   : > { %vm474_vm3 = vcmp.ge.s32.totalorder (!%p279_p9), %v1550_v14, %v1556_v17  ;;  %v1565_v23 = vmul.u32 (!%p279_p9), 64, %v490_v18  ;;  %vm475_vm4 = vcmp.ge.s32.totalorder (!%p279_p9), %v456_v16, %v1556_v17  ;;  %vm476_vm5 = vcmp.ge.s32.totalorder (!%p279_p9), %v457_v19, %v1556_v17 }
  0x15   : > { %s1778_s17 = smov (!%p319_p10, %s1130_s17), 7  ;;  %v462_v25 = vadd.s32 56, %v1550_v14  ;;  %vm477_vm10 = vcmp.ge.s32.totalorder %v458_v20, %v1556_v17  ;;  %vm478_vm12 = vcmp.ge.s32.totalorder %v459_v21, %v1556_v17  ;;  %vm479_vm13 = vcmp.ge.s32.totalorder %v460_v22, %v1556_v17 }
  0x16   : > { %s1169_s18 = sshll.u32 %s1778_s17, 4  ;;  %s1134_s19 = sshll.u32 %s1778_s17, 3  ;;  %vm492_vm6 = vcmp.lt.s32.totalorder %v1550_v14, %v1565_v23  ;;  %vm493_vm7 = vcmp.lt.s32.totalorder %v456_v16, %v1565_v23  ;;  %vm494_vm8 = vcmp.lt.s32.totalorder %v457_v19, %v1565_v23  ;;  %vm495_vm11 = vcmp.lt.s32.totalorder %v458_v20, %v1565_v23 }
  0x17   : > { %s323_s22 = scalar_lea.vmem %s1762_s0, %s1169_s18  ;;  %s329_s25 = scalar_lea.vmem %s1763_s1, %s1134_s19  ;;  %vm508_vm9 = vmand %vm474_vm3, %vm492_vm6  ;;  %vm496_vm15 = vcmp.lt.s32.totalorder %v459_v21, %v1565_v23  ;;  %vm497_vm0 = vcmp.lt.s32.totalorder %v460_v22, %v1565_v23  ;;  %v463_v27 = vadd.s32 64, %v1550_v14  ;;  %v464_v30 = vadd.s32 72, %v1550_v14 }
  0x18   : > { %v339_v1 = vld [vmem:[%s329_s25 + $0x8] sm:$0xff]  ;;  %v334_v2 = vld [vmem:[%s323_s22 + $0x10] sm:$0xff]  ;;  %v335_v3 = vld [vmem:[%s323_s22 + $0x18] sm:$0xff]  ;;  %v1137_v26 = vsel %vm508_vm9, 1.0, %v1438_v0  ;;  %vm498_vm6 = vcmp.lt.s32.totalorder %v461_v24, %v1565_v23  ;;  %v465_v53 = vadd.s32 80, %v1550_v14  ;;  %v466_v54 = vadd.s32 88, %v1550_v14 }
  0x19   : > { %v341_v4 = vpack.c.bf16 %v339_v1, %v339_v1  ;;  %v338_v5 = vld [vmem:[%s329_s25] sm:$0xff]  ;;  %v333_v7 = vld [vmem:[%s323_s22 + $0x8] sm:$0xff]  ;;  %v337_v10 = vpack.c.bf16 %v335_v3, %v334_v2  ;;  %vm509_vm14 = vmand %vm475_vm4, %vm493_vm7  ;;  %v556_v29 = vmul.f32 0.015625, %v1137_v26  ;;  %vm481_vm4 = vcmp.ge.s32.totalorder %v462_v25, %v1556_v17  ;;  %s1378_s17 = sshll.u32 %s1442_s13, 4  ;;  %s1379_s17 = int_to_ptr.vmem [resolvable:$false] %s1378_s17 }
  0x1a   : > { %v332_v6 = vld [vmem:[%s323_s22] sm:$0xff]  ;;  %v340_v8 = vpack.c.bf16 %v338_v5, %v338_v5  ;;  %v1138_v28 = vsel %vm509_vm14, 1.0, %v1438_v0  ;;  %vm511_vm3 = vmand %vm477_vm10, %vm495_vm11  ;;  %vm499_vm7 = vcmp.lt.s32.totalorder %v462_v25, %v1565_v23  ;;  %vm500_vm10 = vcmp.lt.s32.totalorder %v463_v27, %v1565_v23  ;;  %s317_s22 = scalar_lea.vmem [#allocation3], %s1129_s21  ;;  %s1380_s18 = scalar_lea.vmem %s1379_s17, 1024 }
  0x1b   : > { %v395_v9 = vsel %vm346_vm1, %v341_v4, 0  ;;  %v336_v12 = vpack.c.bf16 %v333_v7, %v332_v6  ;;  %v557_v31 = vmul.f32 0.015625, %v1138_v28  ;;  %v1140_v33 = vsel %vm511_vm3, 1.0, %v1438_v0  ;;  %vm513_vm9 = vmand %vm479_vm13, %vm497_vm0  ;;  %v647_v25 = vld [vmem:[%s1764_s2] sm:$0xff]  ;;  %v650_v28 = vld [vmem:[%s1765_s3 + $0x8] sm:$0xff]  ;;  %s1051_s23 = sshll.u32 %s317_s22, 4  ;;  %s1714_s23 = int_to_ptr.vmem [resolvable:$true] %s1051_s23 }
  0x1c   : > { %1213 = vmatpush3.bf16.msra.mxu1 %v395_v9  ;;  %v348_v11 = vsel %vm346_vm1, %v340_v8, 0  ;;  %vm510_vm1 = vmand %vm476_vm5, %vm494_vm8  ;;  %vm482_vm8 = vcmp.ge.s32.totalorder %v463_v27, %v1556_v17  ;;  %v559_v36 = vmul.f32 0.015625, %v1140_v33  ;;  %v1142_v38 = vsel %vm513_vm9, 1.0, %v1438_v0  ;;  %v649_v26 = vld [vmem:[%s1765_s3] sm:$0xff]  ;;  %s1374_s12 = scalar_lea.vmem %s1714_s23, 512  ;;  %p1381_p0 = scmp.lt.s32.totalorder %s1714_s23, %s1379_s17 }
  0x1d   : > { %1207 = vmatpush3.bf16.msra.mxu0 %v348_v11  ;;  %v1139_v32 = vsel %vm510_vm1, 1.0, %v1438_v0  ;;  %vm512_vm5 = vmand %vm478_vm12, %vm496_vm15  ;;  %v1278_v35 = vpack.c.bf16 %v557_v31, %v556_v29  ;;  %vm483_vm12 = vcmp.ge.s32.totalorder %v464_v30, %v1556_v17  ;;  %vm501_vm14 = vcmp.lt.s32.totalorder %v464_v30, %v1565_v23  ;;  %v748_v29 = vld [vmem:[%s1767_s5 + $0x8] sm:$0xff]  ;;  %v955_v30 = vld [vmem:[%s1769_s7] sm:$0xff]  ;;  %p1375_p11 = scmp.ne.s32.totalorder %s1714_s23, %s1374_s12  ;;  %p1382_p1 = scmp.lt.s32.totalorder %s1380_s18, %s1374_s12 }
  0x1e   : > { %v558_v34 = vmul.f32 0.015625, %v1139_v32  ;;  %v1141_v37 = vsel %vm512_vm5, 1.0, %v1438_v0  ;;  %v561_v41 = vmul.f32 0.015625, %v1142_v38  ;;  %vm515_vm13 = vmand %vm481_vm4, %vm499_vm7  ;;  %vm484_vm1 = vcmp.ge.s32.totalorder %v465_v53, %v1556_v17  ;;  %v957_v31 = vld [vmem:[%s1769_s7 + $0x10] sm:$0xff]  ;;  %v956_v38 = vld [vmem:[%s1769_s7 + $0x8] sm:$0xff] }
  0x1f   : > { %1215 = vmatmul.mubr.msk.bf16.vlgmr.msra.gmra.mrb[0].mxu1 %vm342_vm2, %v337_v10  ;;  %v560_v39 = vmul.f32 0.015625, %v1141_v37  ;;  %1279 = vmatprep.subr.bf16.mxu0 %v1278_v35  ;;  %v1144_v43 = vsel %vm515_vm13, 1.0, %v1438_v0  ;;  %vm516_vm15 = vmand %vm482_vm8, %vm500_vm10  ;;  %vm502_vm3 = vcmp.lt.s32.totalorder %v465_v53, %v1565_v23  ;;  %vm503_vm4 = vcmp.lt.s32.totalorder %v466_v54, %v1565_v23  ;;  %v747_v37 = vld [vmem:[%s1767_s5] sm:$0xff]  ;;  %p1376_p12 = pnand %p1375_p11, %p1529_p5  ;;  %p1383_p2 = por %p1382_p1, %p1381_p0 }
  0x20   : > { %1209 = vmatmul.mubr.msk.bf16.vlgmr.msra.gmra.mrb[0].mxu0 %vm342_vm2, %v336_v12  ;;  %vm480_vm2 = vcmp.ge.s32.totalorder %v461_v24, %v1556_v17  ;;  %v1282_v40 = vpack.c.bf16 %v559_v36, %v558_v34  ;;  %v563_v46 = vmul.f32 0.015625, %v1144_v43  ;;  %vm517_vm0 = vmand %vm483_vm12, %vm501_vm14  ;;  %v1145_v47 = vsel %vm516_vm15, 1.0, %v1438_v0  ;;  %v745_v36 = vld [vmem:[%s1766_s4] sm:$0xff] }
  0x21   : > { %vm514_vm11 = vmand %vm480_vm2, %vm498_vm6  ;;  %1281 = vmatpush3.bf16.msra.mxu0 %v1278_v35  ;;  %v1286_v44 = vpack.c.bf16 %v561_v41, %v560_v39  ;;  %v1146_v48 = vsel %vm517_vm0, 1.0, %v1438_v0  ;;  %v564_v50 = vmul.f32 0.015625, %v1145_v47  ;;  %vm485_vm2 = vcmp.ge.s32.totalorder %v466_v54, %v1556_v17  ;;  %v648_v35 = vld [vmem:[%s1764_s2 + $0x8] sm:$0xff]  ;;  %v958_v39 = vld [vmem:[%s1769_s7 + $0x18] sm:$0xff]  ;;  %p1377_p13 = pneg %p1376_p12 }
  0x22   : > { %v1143_v42 = vsel %vm514_vm11, 1.0, %v1438_v0  ;;  %1283 = vmatprep.subr.bf16.mxu0 %v1282_v40  ;;  %v565_v51 = vmul.f32 0.015625, %v1146_v48  ;;  %vm518_vm6 = vmand %vm484_vm1, %vm502_vm3  ;;  %v467_v56 = vadd.s32 96, %v1550_v14  ;;  %v468_v57 = vadd.s32 104, %v1550_v14 }
  0x23   : > { %v562_v45 = vmul.f32 0.015625, %v1143_v42  ;;  %vm519_vm5 = vmand %vm485_vm2, %vm503_vm4  ;;  %v1147_v55 = vsel %vm518_vm6, 1.0, %v1438_v0  ;;  %v469_v63 = vadd.s32 112, %v1550_v14  ;;  %v470_v1 = vadd.s32 120, %v1550_v14  ;;  %p1384_p3 = pnand %p1383_p2, %p1377_p13 }
  0x24   : > { %v1294_v52 = vpack.c.bf16 %v565_v51, %v564_v50  ;;  %v1148_v58 = vsel %vm519_vm5, 1.0, %v1438_v0  ;;  %v566_v59 = vmul.f32 0.015625, %v1147_v55  ;;  %vm486_vm7 = vcmp.ge.s32.totalorder %v467_v56, %v1556_v17 }
  0x25   : > { %1285 = vmatpush3.bf16.msra.mxu0 %v1282_v40  ;;  %v1290_v49 = vpack.c.bf16 %v563_v46, %v562_v45  ;;  %v567_v60 = vmul.f32 0.015625, %v1148_v58  ;;  %vm487_vm8 = vcmp.ge.s32.totalorder %v468_v57, %v1556_v17  ;;  %vm504_vm9 = vcmp.lt.s32.totalorder %v467_v56, %v1565_v23 }
  0x26   : > { %1287 = vmatprep.subr.bf16.mxu0 %v1286_v44  ;;  %vm505_vm10 = vcmp.lt.s32.totalorder %v468_v57, %v1565_v23  ;;  %vm520_vm11 = vmand %vm486_vm7, %vm504_vm9  ;;  %vm488_vm14 = vcmp.ge.s32.totalorder %v469_v63, %v1556_v17  ;;  %vm489_vm13 = vcmp.ge.s32.totalorder %v470_v1, %v1556_v17  ;;  %vm506_vm15 = vcmp.lt.s32.totalorder %v469_v63, %v1565_v23 }
  0x27   : > { %v1298_v61 = vpack.c.bf16 %v567_v60, %v566_v59  ;;  %vm521_vm12 = vmand %vm487_vm8, %vm505_vm10  ;;  %v1149_v62 = vsel %vm520_vm11, 1.0, %v1438_v0  ;;  %vm507_vm0 = vcmp.lt.s32.totalorder %v470_v1, %v1565_v23  ;;  %vm438_vm3 = vcmask 523264  }
  0x28   : > { %v1150_v2 = vsel %vm521_vm12, 1.0, %v1438_v0  ;;  %v568_v3 = vmul.f32 0.015625, %v1149_v62  ;;  %vm522_vm1 = vmand %vm488_vm14, %vm506_vm15  ;;  %vm449_vm4 = vcmask 1048064   ;;  %vm661_vm6 = vcmask 130048  }
  0x29   : > { %1289 = vmatpush3.bf16.msra.mxu0 %v1286_v44  ;;  %v569_v4 = vmul.f32 0.015625, %v1150_v2  ;;  %vm523_vm2 = vmand %vm489_vm13, %vm507_vm0  ;;  %v1151_v6 = vsel %vm522_vm1, 1.0, %v1438_v0  ;;  %1257 = vmatprep.mubr.msk.f32.mxu1 %vm661_vm6, %v647_v25  ;;  %v1441_v27 = vmov 0   ;;  %v852_v50 = vmul.u32 64, %v1550_v14  ;;  %v948_v2 = vld [vmem:[%s1768_s6] sm:$0xff] }
  0x2a   : > { %1291 = vmatprep.subr.bf16.mxu0 %v1290_v49  ;;  %v1152_v7 = vsel %vm523_vm2, 1.0, %v1438_v0  ;;  %v570_v8 = vmul.f32 0.015625, %v1151_v6  ;;  %1364 = vset.pattern.permute.xlu1 %v1441_v27  ;;  %v854_v51 = vadd.s32 1, %v1550_v14  ;;  %vm867_vm8 = vcmask 1041408  }
  0x2b   : > { %v1302_v5 = vpack.c.bf16 %v569_v4, %v568_v3  ;;  %v571_v9 = vmul.f32 0.015625, %v1152_v7  ;;  %1365 = vset.pattern.permute.xlu0 %v1441_v27  ;;  %653 = vperm.xlu1 %1364, %v649_v26   ;;  %vm853_vm5 = vcmp.ge.s32.totalorder %v1552_v15, %v852_v50  ;;  %vm860_vm10 = vcmask 15360   ;;  %v949_v3 = vld [vmem:[%s1768_s6 + $0x8] sm:$0xff] }
  0x2c   : > { %v952_v4 = vpack.c.bf16 %v949_v3, %v948_v2 }
  0x2d   : > { %1293 = vmatpush3.bf16.msra.mxu0 %v1290_v49  ;;  %v1306_v10 = vpack.c.bf16 %v571_v9, %v570_v8  ;;  %v746_v49 = vld [vmem:[%s1766_s4 + $0x8] sm:$0xff]  ;;  %v950_v9 = vld [vmem:[%s1768_s6 + $0x10] sm:$0xff] }
  0x2e   : > { %1295 = vmatprep.subr.bf16.mxu0 %v1294_v52 }
  0x2f   : > { %658 = vperm.xlu1 %1364, %v650_v28  }
  0x31   : > { %1297 = vmatpush3.bf16.msra.mxu0 %v1294_v52  ;;  %v855_v52 = vmul.u32 64, %v854_v51 }
  0x32   : > { %1299 = vmatprep.subr.bf16.mxu0 %v1298_v61 }
  0x33   : > { %756 = vperm.xlu1 %1364, %v748_v29   ;;  %vm856_vm7 = vcmp.lt.s32.totalorder %v1552_v15, %v855_v52 }
  0x34   : > { %vm857_vm9 = vmand %vm853_vm5, %vm856_vm7 }
  0x35   : > { %1301 = vmatpush3.bf16.msra.mxu0 %v1298_v61  ;;  %v1159_v53 = vsel %vm857_vm9, 1.0, %v1438_v0 }
  0x36   : > { %1303 = vmatprep.subr.bf16.mxu0 %v1302_v5 }
  0x37   : > { %961 = vperm.xlu1 %1364, %v955_v30  }
  0x39   : > { %1305 = vmatpush3.bf16.msra.mxu0 %v1302_v5 }
  0x3a   : > { %1307 = vmatprep.subr.bf16.mxu0 %v1306_v10 }
  0x3b   : > { %971 = vperm.xlu1 %1364, %v957_v31  }
  0x3d   : > { %1309 = vmatpush3.bf16.msra.mxu0 %v1306_v10  ;;  %v951_v10 = vld [vmem:[%s1768_s6 + $0x18] sm:$0xff] }
  0xaa   : > { %v654_v40 = vpop.permute.xlu1 %653 }
  0xae   : > { %v659_v41 = vpop.permute.xlu1 %658 }
  0xb2   : > { %v757_v54 = vpop.permute.xlu1 %756 }
  0xf2   : > { %v431_v11 = vpop.f32.mrb[0].mxu1 }
  0xf3   : > { %443 = vrot.lane.b32.xlu0 %v431_v11, %s1440_s26  ;;  %v1216_v12 = vpop.f32.mrb[1].mxu1  ;;  %v384_v13 = vpop.f32.mrb[0].mxu0 }
  0xf4   : > { %v434_v16 = vpop.f32.mrb[2].mxu1  ;;  %439 = vst.msk [vmem:[#allocation2] sm:$0xff] %vm438_vm3, %v384_v13  ;;  %v1210_v17 = vpop.f32.mrb[1].mxu0  ;;  %v953_v12 = vpack.c.bf16 %v951_v10, %v950_v9 }
  0xf5   : > { %v1217_v18 = vpop.f32.mrb[3].mxu1  ;;  %v387_v19 = vpop.f32.mrb[2].mxu0 }
  0xf6   : > { %440 = vst.msk [vmem:[#allocation2 + $0x8] sm:$0xff] %vm438_vm3, %v387_v19  ;;  %v1211_v20 = vpop.f32.mrb[3].mxu0  ;;  %v962_v13 = vpop.permute.xlu1 %961 }
  0xf7   : > { %445 = vrot.lane.b32.xlu0 %v434_v16, %s1440_s26 }
  0xfa   : > { %v972_v17 = vpop.permute.xlu1 %971 }
  0xfb   : > { %751 = vperm.xlu0 %1365, %v747_v37  }
  0xff   : > { %966 = vperm.xlu0 %1365, %v956_v38  }
 0x103   : > { %976 = vperm.xlu0 %1365, %v958_v39  }
 0x165   : > { %v444_v21 = vpop.permute.xlu0 %443 }
 0x166   : > { %450 = vst.msk [vmem:[#allocation2] sm:$0xff] %vm449_vm4, %v444_v21 }
 0x169   : > { %v446_v22 = vpop.permute.xlu0 %445 }
 0x16a   : > { %451 = vst.msk [vmem:[#allocation2 + $0x8] sm:$0xff] %vm449_vm4, %v446_v22 }
 0x16d   : > { %v1645_v23 = vld [vmem:[#allocation2] sm:$0xff] }
 0x16e   : > { %1250 = vmatprep.mubr.f32.mxu0 %v1645_v23 }
 0x171   : > { %v1648_v24 = vld [vmem:[#allocation2 + $0x8] sm:$0xff] }
 0x172   : > { %1251 = vmatmul.mubr.f32.vlgmr.msra.gmra.mrb[4].mxu0 %v1648_v24 }
 0x17a   : > { %v752_v56 = vpop.permute.xlu0 %751 }
 0x17e   : > { %v967_v16 = vpop.permute.xlu0 %966 }
 0x182   : > { %v977_v21 = vpop.permute.xlu0 %976 }
 0x245   : > { %v1252_v32 = vpop.f32.mrb[4].mxu0 }
 0x246   : > { %v638_v33 = vpop.f32.mrb[5].mxu0 }
 0x247   : > { %v1310_v34 = vpack.c.bf16 %v1252_v32, %v638_v33 }
 0x249   : > { %1311 = vmatprep.subr.bf16.mxu1 %v1310_v34 }
 0x24a   : > { %1313 = vmatpush3.bf16.msra.mxu1 %v1310_v34 }
 0x24d   : > { %1258 = vmatmul.mubr.msk.f32.vlgmr.msra.gmra.mrb[4].mxu1 %vm661_vm6, %v648_v35 }
 0x24e   : > { %1264 = vmatprep.mubr.msk.f32.mxu1 %vm661_vm6, %v745_v36 }
 0x320   : > { %v1259_v42 = vpop.f32.mrb[4].mxu1 }
 0x321   : > { %v740_v43 = vadd.f32 %v1259_v42, %v659_v41  ;;  %v734_v44 = vpop.f32.mrb[5].mxu1 }
 0x322   : > { %v735_v45 = vadd.f32 %v734_v44, %v654_v40 }
 0x323   : > { %v744_v46 = vmax.f32 %v740_v43, 0.0 }
 0x324   : > { %v743_v47 = vmax.f32 %v735_v45, 0.0 }
 0x326   : > { %v1314_v48 = vpack.c.bf16 %v744_v46, %v743_v47 }
 0x328   : > { %1315 = vmatprep.subr.bf16.mxu1 %v1314_v48 }
 0x329   : > { %1317 = vmatpush3.bf16.msra.mxu1 %v1314_v48 }
 0x32a   : > { %1267 = vmatprep.subr.msk.mxu1 %vm867_vm8, %v1159_v53 }
 0x32c   : > { %1265 = vmatmul.mubr.msk.f32.vlgmr.msra.gmra.mrb[6].mxu1 %vm661_vm6, %v746_v49 }
 0x32d   : > { %1268 = vmatpush3.msk.msra.mxu1 %vm867_vm8, %v1159_v53 }
 0x3ff   : > { %v1266_v55 = vpop.f32.mrb[6].mxu1 }
 0x400   : > { %v837_v57 = vadd.f32 %v1266_v55, %v757_v54  ;;  %v831_v58 = vpop.f32.mrb[7].mxu1 }
 0x401   : > { %v832_v59 = vadd.f32 %v831_v58, %v752_v56 }
 0x402   : > { %v1158_v60 = vmul.f32 -1.442695, %v837_v57 }
 0x403   : > { %v1157_v61 = vmul.f32 -1.442695, %v832_v59 }
 0x404   : > { %1366 = vpow2.f32 %v1158_v60 }
 0x405   : > { %1368 = vpow2.f32 %v1157_v61 }
 0x40e   : > { %v1367_v14 = vpop.eup %1366 }
 0x40f   : > { %v1369_v62 = vpop.eup %1368  ;;  %v847_v63 = vadd.f32 1.0, %v1367_v14 }
 0x410   : > { %v846_v15 = vadd.f32 1.0, %v1369_v62 }
 0x412   : > { %1370 = vrcp.f32 %v846_v15 }
 0x413   : > { %1372 = vrcp.f32 %v847_v63 }
 0x41c   : > { %v1371_v0 = vpop.eup %1370 }
 0x41d   : > { %v1373_v1 = vpop.eup %1372  ;;  %1269 = vmatprep.mubr.msk.f32.mxu1 %vm860_vm10, %v1371_v0 }
 0x41e   : > { %1270 = vmatmul.mubr.msk.f32.vlgmr.msra.gmra.mrb[8].mxu1 %vm860_vm10, %v1373_v1 }
 0x41f   : > { %1274 = vmatprep.mubr.msk.bf16.mxu1 %vm661_vm6, %v952_v4 }
 0x4f1   : > { %v1271_v5 = vpop.f32.mrb[8].mxu1 }
 0x4f2   : > { %v947_v6 = vmul.f32 %v1271_v5, %v1648_v24  ;;  %v937_v7 = vpop.f32.mrb[9].mxu1 }
 0x4f3   : > { %v946_v8 = vmul.f32 %v937_v7, %v1645_v23 }
 0x4f5   : > { %v954_v11 = vpack.c.bf16 %v947_v6, %v946_v8 }
 0x4f7   : > { %1272 = vmatprep.subr.bf16.mxu1 %v954_v11 }
 0x4f8   : > { %1273 = vmatpush3.bf16.msra.mxu1 %v954_v11 }
 0x4fb   : > { %1275 = vmatmul.mubr.msk.bf16.vlgmr.msra.gmra.mrb[12].mxu1 %vm661_vm6, %v953_v12 }
 0x5ce   : > { %v1276_v18 = vpop.f32.mrb[12].mxu1 }
 0x5cf   : > { %v1028_v19 = vadd.f32 %v1276_v18, %v972_v17  ;;  %v1019_v20 = vpop.f32.mrb[13].mxu1 }
 0x5d0   : > { %v1020_v22 = vadd.f32 %v1019_v20, %v962_v13  ;;  %v1277_v23 = vpop.f32.mrb[14].mxu1 }
 0x5d1   : > { %1036 = vst [vmem:[%s317_s22 + $0x10] sm:$0xff] %v1028_v19  ;;  %v1031_v24 = vadd.f32 %v1277_v23, %v977_v21  ;;  %v1022_v25 = vpop.f32.mrb[15].mxu1 }
 0x5d2   : > { %1034 = vst [vmem:[%s317_s22] sm:$0xff] %v1020_v22  ;;  %v1023_v26 = vadd.f32 %v1022_v25, %v967_v16 }
 0x5d3   : > { %1037 = vst [vmem:[%s317_s22 + $0x18] sm:$0xff] %v1031_v24 }
 0x5d4   : > { %1035 = vst [vmem:[%s317_s22 + $0x8] sm:$0xff] %v1023_v26 }
 0x5d5   : > { %1387 = shalt.err (!%p1384_p3)
}
 0x5d6   : > { %s1388_s19 = scalar_lea.hbm %s1719_s10, 512  ;;  %s1392_s22 = scalar_lea.hbm %s1770_s8, 2048 }
 0x5d7   : > { %p1389_p4 = scmp.ne.s32.totalorder %s1719_s10, %s1388_s19  ;;  %p1393_p9 = scmp.lt.u32.totalorder %s1719_s10, %s1770_s8 }
 0x5d8   : > { %p1394_p10 = scmp.lt.u32.totalorder %s1392_s22, %s1388_s19  ;;  %p1396_p12 = scmp.lt.u32.totalorder %s1388_s19, %s1719_s10 }
 0x5d9   : > { %p1390_p7 = pnand %p1389_p4, %p1529_p5 }
 0x5da   : > { %p1395_p11 = por %p1394_p10, %p1393_p9 }
 0x5db   : > { %p1391_p8 = pneg %p1390_p7 }
 0x5dc   : > { %p1397_p13 = por %p1396_p12, %p1395_p11 }
 0x5de   : > { %p1398_p0 = pnand %p1397_p13, %p1391_p8 }
 0x5e0   : > { %1401 = shalt.err (!%p1398_p0)
}
 0x5e1   : > { %s1443_s26 = smov 128   ;;  %s1444_s12 = smov 512  }
 0x5e2   : > { %s1445_s13 = smov 8  }
 0x5e3   : > { %1318 = dma.vmem_to_hbm [thread:$0]  (%p1529_p5), %s1714_s23, 512, %s1719_s10, %s1721_s9, %s1443_s26, %s1444_s12, %s1445_s13  }
 0x5e4 PF: > { %p1324_p1 = scmp.ge.s32.totalorder %s1436_s30, 2  ;;  %s1066_s17 = sand.u32 1, %s1424_s27  }
 0x5e5   : > { %s1067_s18 = scalar_lea.sflag [#allocation4], %s1066_s17 }
 0x5e6   : > { %p1321_p2 = pnand %p1324_p1, %p1533_p6 }
 0x5e8   : > { %1419 = dma.done.wait (!%p1321_p2), %s1067_s18, 512  }
 0x5e9   : > { %1421 = vsyncadd (!%p1321_p2), %s1067_s18, 4294966784  ;;  %p18_p3 = scmp.ge.s32.totalorder %s1516_s11, 6   ;;  %s1773_s27 = smov %s1428_s28 }
 0x5ea   : > { %s1774_s28 = smov %s1432_s29  ;;  %s1775_s29 = smov %s1527_s14 }
 0x5eb   : > { %s1776_s30 = smov %s1516_s11  ;;  %20 = sbr.rel (!%p18_p3) target bundleno = 3 (0x3), region = 90 }
 0x5f2   :  { %1072 = vsyncpa [#allocation4], 1 }
 0x5f3   :  { %1074 = vsyncpa [#allocation4 + $0x1], 1 }

</bundles_post_ra>
